<compile_context>
chip_gen: v7x
topology: tpu7x:2x2x1
jax: 0.10.0
libtpu: 0.0.40
codegen_flags: <defaults>
</compile_context>

<pallas_src>
import functools

import jax
import jax.numpy as jnp
from jax.experimental import pallas as pl
from jax.experimental.pallas import tpu as pltpu

_LANE = 128
_SUBLANE = 8
_VMEM_LIMIT = 48 * 1024 * 1024   # < v7x 64 MiB physical; plenty of headroom elsewhere
_FUSE_MAX_N = 512                # fused single-launch path when N <= this
_TM = 256                        # row tile (tiled path); keeps >=2 row tiles for v7x
_TK_MAX = 1024                   # neighbor/reduction tile (tiled path)


def _round_up(x, m):
    return ((x + m - 1) // m) * m


# ---------------------------------------------------------------------------
# Fused single-launch kernel (whole graph resident in VMEM).
# ---------------------------------------------------------------------------
def _fused_sage_kernel(adj_ref, x0_ref, wrel_ref, wroot_ref, brel_ref,
                       gamma_ref, beta_ref, wlin_ref, blin_ref, out_ref,
                       *, n_valid: int, ones_col: int, apply_bn: bool, eps: float):
    adj = adj_ref[...]                                    # (Np, Np) bf16 (0/1 exact)
    x0 = x0_ref[...]                                      # (Np, Cp) f32, relu'd + ones col
    # Aggregation: bf16 x bf16 MXU matmul with f32 accumulation.  The constant ones
    # column of x0 makes acc[:, ones_col] the row degree inside the same matmul.
    acc = jnp.dot(adj, x0.astype(jnp.bfloat16), preferred_element_type=jnp.float32)
    deg = jnp.maximum(acc[:, ones_col:ones_col + 1], 1.0)        # clamp(min=1)
    agg = acc / deg                                              # exact divide

    # lin_rel(agg) + lin_root(x0): two 128-deep dots (no concat relayout).
    conv = (jnp.dot(agg, wrel_ref[...], preferred_element_type=jnp.float32)
            + jnp.dot(x0, wroot_ref[...], preferred_element_type=jnp.float32)
            + brel_ref[...])
    x1 = jnp.maximum(conv, 0.0)

    if apply_bn:  # static Python branch; mirrors `if h.shape[0] > 1`
        rows = jax.lax.broadcasted_iota(jnp.int32, x1.shape, 0)
        valid = (rows < n_valid).astype(jnp.float32)             # mask padded rows
        xv = x1 * valid
        inv_n = 1.0 / float(n_valid)
        mean = jnp.sum(xv, axis=0, keepdims=True) * inv_n
        var = jnp.maximum(jnp.sum(xv * xv, axis=0, keepdims=True) * inv_n
                          - mean * mean, 0.0)                    # biased (training) var
        scale = gamma_ref[...] * jax.lax.rsqrt(var + eps)
        x = (x1 - mean) * scale + beta_ref[...]
    else:
        x = x1

    y = jnp.dot(x, wlin_ref[...], preferred_element_type=jnp.float32) + blin_ref[...]
    out_ref[...] = jnp.maximum(y, 0.0)


# ---------------------------------------------------------------------------
# Tiled path, pass 1: K-tiled aggregation + SAGE conv (+ReLU) + BN partial stats.
# ---------------------------------------------------------------------------
def _sage_conv_kernel(adj_ref, x0k_ref, x0i_ref, wrel_ref, wroot_ref, brel_ref,
                      x1_ref, stats_ref, acc_ref,
                      *, tm: int, n_valid: int, ones_col: int):
    # Read program ids ONCE at the top level; `pl.program_id` inside a `pl.when`
    # body is what broke the previous lowering.
    i = pl.program_id(0)
    k = pl.program_id(1)
    nk = pl.num_programs(1)

    @pl.when(k == 0)
    def _():
        acc_ref[...] = jnp.zeros_like(acc_ref)

    # bf16 x bf16 -> f32 accumulation; the ones column accumulates the row degree.
    acc_ref[...] += jnp.dot(adj_ref[...], x0k_ref[...],
                            preferred_element_type=jnp.float32)

    @pl.when(k == nk - 1)
    def _():
        acc = acc_ref[...]
        deg = jnp.maximum(acc[:, ones_col:ones_col + 1], 1.0)
        agg = acc / deg
        x0_rows = x0i_ref[...].astype(jnp.float32)
        conv = (jnp.dot(agg, wrel_ref[...], preferred_element_type=jnp.float32)
                + jnp.dot(x0_rows, wroot_ref[...], preferred_element_type=jnp.float32)
                + brel_ref[...])
        x1 = jnp.maximum(conv, 0.0)
        x1_ref[...] = x1.astype(x1_ref.dtype)                    # bf16 intermediate

        # Lane-dense BN partial stats for this row tile (padded rows masked out).
        rows = jax.lax.broadcasted_iota(jnp.int32, x1.shape, 0) + i * tm
        valid = (rows < n_valid).astype(jnp.float32)
        xv = x1 * valid
        ssum = jnp.sum(xv, axis=0, keepdims=True)                # (1, Hp)
        ssq = jnp.sum(xv * xv, axis=0, keepdims=True)            # (1, Hp)
        stats_ref[...] = jnp.concatenate([ssum, ssq], axis=-1)   # (1, 2*Hp)


# ---------------------------------------------------------------------------
# Tiled path, pass 2: BatchNorm affine + Linear + ReLU, tiled over rows.
# ---------------------------------------------------------------------------
def _bn_linear_kernel(x1_ref, scale_ref, shift_ref, wlin_ref, blin_ref, out_ref):
    x = x1_ref[...].astype(jnp.float32) * scale_ref[...] + shift_ref[...]
    y = jnp.dot(x, wlin_ref[...], preferred_element_type=jnp.float32) + blin_ref[...]
    out_ref[...] = jnp.maximum(y, 0.0)


def g_sage_forward(h, adj, params, *, eps=1e-5):
    """h: (N, Cin) f32, adj: (N, N) 0/1 f32. Returns (N, out_channels) f32."""
    N, cin = h.shape
    hid = params["w_rel"].shape[1]
    out_c = params["w_lin"].shape[1]
    f32 = jnp.float32
    bf16 = jnp.bfloat16

    cp = _round_up(cin + 1, _LANE)          # +1: constant ones column -> row degree
    hp = _round_up(hid, _LANE)
    op = _round_up(out_c, _LANE)
    ones_col = cin

    # ---- padded weights (all stored transposed (in, out)) -------------------
    w_rel_p = jnp.zeros((cp, hp), f32).at[:cin, :hid].set(params["w_rel"].astype(f32))
    w_root_p = jnp.zeros((cp, hp), f32).at[:cin, :hid].set(params["w_root"].astype(f32))
    b_rel_p = jnp.zeros((1, hp), f32).at[:, :hid].set(params["b_rel"].astype(f32))
    gamma_p = jnp.zeros((1, hp), f32).at[:, :hid].set(params["gamma"].astype(f32))
    beta_p = jnp.zeros((1, hp), f32).at[:, :hid].set(params["beta"].astype(f32))
    w_lin_p = jnp.zeros((hp, op), f32).at[:hid, :out_c].set(params["w_lin"].astype(f32))
    b_lin_p = jnp.zeros((1, op), f32).at[:, :out_c].set(params["b_lin"].astype(f32))

    x0 = jnp.maximum(h.astype(f32), 0.0)    # x0 = relu(h), hoisted out of the kernels

    # -------------------- fused single-launch path (small N) -----------------
    if N <= _FUSE_MAX_N:
        np_ = _round_up(N, _SUBLANE)
        x0_p = (jnp.zeros((np_, cp), f32)
                .at[:N, :cin].set(x0)
                .at[:, ones_col].set(1.0))
        # padded adjacency built directly in bf16 (exact for 0/1), no f32 N^2 temp
        adj_p = jnp.zeros((np_, np_), bf16).at[:N, :N].set(adj.astype(bf16))

        kernel = functools.partial(_fused_sage_kernel, n_valid=N, ones_col=ones_col,
                                   apply_bn=(N > 1), eps=eps)
        out_p = pl.pallas_call(
            kernel,
            out_shape=jax.ShapeDtypeStruct((np_, op), f32),
            compiler_params=pltpu.CompilerParams(vmem_limit_bytes=_VMEM_LIMIT),
        )(adj_p, x0_p, w_rel_p, w_root_p, b_rel_p, gamma_p, beta_p, w_lin_p, b_lin_p)
        return out_p[:N, :out_c]

    # ---------------------------- tiled two-pass path ------------------------
    tm = _TM
    np_ = _round_up(N, tm)
    tk = np_ if np_ <= 2048 else _TK_MAX    # wide reduction tile amortizes step cost
    np_ = _round_up(np_, tk)
    g_rows = np_ // tm
    g_k = np_ // tk

    x0_bf = (jnp.zeros((np_, cp), bf16)
             .at[:N, :cin].set(x0.astype(bf16))
             .at[:, ones_col].set(1.0))
    adj_p = jnp.zeros((np_, np_), bf16).at[:N, :N].set(adj.astype(bf16))

    kernel1 = functools.partial(_sage_conv_kernel, tm=tm, n_valid=N, ones_col=ones_col)
    cost1 = pl.CostEstimate(
        flops=2 * np_ * np_ * cp + 4 * np_ * cp * hp,
        transcendentals=0,
        bytes_accessed=(adj_p.size * 2 + (g_rows + 1) * np_ * cp * 2 + np_ * hp * 2))

    x1_p, stats = pl.pallas_call(
        kernel1,
        grid=(g_rows, g_k),
        in_specs=[
            pl.BlockSpec((tm, tk), lambda i, k: (i, k)),        # adj tile (bf16)
            pl.BlockSpec((tk, cp), lambda i, k: (k, 0)),        # x0 neighbor rows
            pl.BlockSpec((tm, cp), lambda i, k: (i, 0)),        # x0 root rows
            pl.BlockSpec((cp, hp), lambda i, k: (0, 0)),        # w_rel
            pl.BlockSpec((cp, hp), lambda i, k: (0, 0)),        # w_root
            pl.BlockSpec((1, hp), lambda i, k: (0, 0)),         # b_rel
        ],
        out_specs=[
            pl.BlockSpec((tm, hp), lambda i, k: (i, 0)),        # x1 (bf16)
            pl.BlockSpec((1, 2 * hp), lambda i, k: (i, 0)),     # BN partials (lane-dense)
        ],
        out_shape=[
            jax.ShapeDtypeStruct((np_, hp), bf16),
            jax.ShapeDtypeStruct((g_rows, 2 * hp), f32),
        ],
        scratch_shapes=[pltpu.VMEM((tm, cp), f32)],
        compiler_params=pltpu.CompilerParams(
            dimension_semantics=("parallel", "arbitrary"),
            vmem_limit_bytes=_VMEM_LIMIT),
        cost_estimate=cost1,
    )(adj_p, x0_bf, x0_bf, w_rel_p, w_root_p, b_rel_p)

    # BatchNorm scale/shift from full-N statistics (N > 1 guaranteed on this path).
    tot = jnp.sum(stats, axis=0)                         # (2*Hp,)
    mean = (tot[:hp] / N)[None, :]
    var = jnp.maximum((tot[hp:] / N)[None, :] - mean * mean, 0.0)
    scale = gamma_p * jax.lax.rsqrt(var + eps)
    shift = beta_p - mean * scale

    out_p = pl.pallas_call(
        _bn_linear_kernel,
        grid=(g_rows,),
        in_specs=[
            pl.BlockSpec((tm, hp), lambda i: (i, 0)),
            pl.BlockSpec((1, hp), lambda i: (0, 0)),
            pl.BlockSpec((1, hp), lambda i: (0, 0)),
            pl.BlockSpec((hp, op), lambda i: (0, 0)),
            pl.BlockSpec((1, op), lambda i: (0, 0)),
        ],
        out_specs=pl.BlockSpec((tm, op), lambda i: (i, 0)),
        out_shape=jax.ShapeDtypeStruct((np_, op), f32),
        compiler_params=pltpu.CompilerParams(
            dimension_semantics=("parallel",),
            vmem_limit_bytes=_VMEM_LIMIT),
    )(x1_p, scale, shift, w_lin_p, b_lin_p)

    return out_p[:N, :out_c]


def init_params(key, in_channels, hidden_channels, out_channels):
    """Deterministic synthetic parameters (weights stored transposed (in, out))."""
    ks = jax.random.split(key, 5)
    s_in = 1.0 / jnp.sqrt(jnp.float32(in_channels))
    s_hid = 1.0 / jnp.sqrt(jnp.float32(hidden_channels))
    return {
        # DenseSAGEConv.lin_rel: Linear(in, hidden, bias=True)
        "w_rel": jax.random.normal(ks[0], (in_channels, hidden_channels), jnp.float32) * s_in,
        "b_rel": jax.random.normal(ks[1], (1, hidden_channels), jnp.float32) * s_in,
        # DenseSAGEConv.lin_root: Linear(in, hidden, bias=False)
        "w_root": jax.random.normal(ks[2], (in_channels, hidden_channels), jnp.float32) * s_in,
        # BatchNorm1d(hidden): fresh gamma=1, beta=0
        "gamma": jnp.ones((1, hidden_channels), jnp.float32),
        "beta": jnp.zeros((1, hidden_channels), jnp.float32),
        # Linear(hidden, out)
        "w_lin": jax.random.normal(ks[3], (hidden_channels, out_channels), jnp.float32) * s_hid,
        "b_lin": jax.random.normal(ks[4], (1, out_channels), jnp.float32) * s_hid,
    }


if __name__ == "__main__":
    N, in_channels, hidden_channels, out_channels = 8, 4, 32, 16

    key = jax.random.PRNGKey(0)
    k_h, k_adj, k_p = jax.random.split(key, 3)

    h = jax.random.normal(k_h, (N, in_channels), jnp.float32)
    # symmetric 0/1 adjacency with self loops (bf16-exact)
    a = (jax.random.uniform(k_adj, (N, N)) < 0.4).astype(jnp.float32)
    adj = jnp.clip(a + a.T + jnp.eye(N, dtype=jnp.float32), 0.0, 1.0)

    params = init_params(k_p, in_channels, hidden_channels, out_channels)

    fwd = jax.jit(g_sage_forward)
    out = fwd(h, adj, params)
    jax.block_until_ready(out)
    assert out.shape == (N, out_channels)
    assert bool(jnp.all(jnp.isfinite(out)))
    print("KERNEL_OK")
</pallas_src>

<mosaic_0001>
module attributes {stable_mosaic.version = 11 : i64} {
  func.func @_fused_sage_kernel(%arg0: memref<8x8xbf16, #tpu.memory_space<vmem>>, %arg1: memref<8x128xf32, #tpu.memory_space<vmem>>, %arg2: memref<128x128xf32, #tpu.memory_space<vmem>>, %arg3: memref<128x128xf32, #tpu.memory_space<vmem>>, %arg4: memref<1x128xf32, #tpu.memory_space<vmem>>, %arg5: memref<1x128xf32, #tpu.memory_space<vmem>>, %arg6: memref<1x128xf32, #tpu.memory_space<vmem>>, %arg7: memref<128x128xf32, #tpu.memory_space<vmem>>, %arg8: memref<1x128xf32, #tpu.memory_space<vmem>>, %arg9: memref<8x128xf32, #tpu.memory_space<vmem>>) attributes {dimension_semantics = [], scalar_prefetch = 0 : i64, scratch_operands = 0 : i64, tpu.core_type = #tpu.core_type<tc>} {
    %c0 = arith.constant 0 : index
    %c0_0 = arith.constant 0 : index
    %0 = vector.load %arg0[%c0, %c0_0] : memref<8x8xbf16, #tpu.memory_space<vmem>>, vector<8x8xbf16>
    %c0_1 = arith.constant 0 : index
    %c0_2 = arith.constant 0 : index
    %1 = vector.load %arg1[%c0_1, %c0_2] : memref<8x128xf32, #tpu.memory_space<vmem>>, vector<8x128xf32>
    %2 = arith.truncf %1 : vector<8x128xf32> to vector<8x128xbf16>
    %cst = arith.constant dense<0.000000e+00> : vector<8x128xf32>
    %3 = tpu.matmul %0, %2, %cst {dimension_numbers = #tpu.dot_dimension_numbers<[1], [0], [0], [1], [0, 0, 1, 1], [], []>} : vector<8x8xbf16>, vector<8x128xbf16>, vector<8x128xf32> -> vector<8x128xf32>
    %4 = vector.extract_strided_slice %3 {offsets = [0, 4], sizes = [8, 1], strides = [1, 1]} : vector<8x128xf32> to vector<8x1xf32>
    %cst_3 = arith.constant 1.000000e+00 : f32
    %5 = vector.broadcast %cst_3 : f32 to vector<8x1xf32>
    %6 = arith.maximumf %4, %5 : vector<8x1xf32>
    %7 = vector.broadcast %6 : vector<8x1xf32> to vector<8x128xf32>
    %8 = arith.divf %3, %7 : vector<8x128xf32>
    %c0_4 = arith.constant 0 : index
    %c0_5 = arith.constant 0 : index
    %9 = vector.load %arg2[%c0_4, %c0_5] : memref<128x128xf32, #tpu.memory_space<vmem>>, vector<128x128xf32>
    %cst_6 = arith.constant dense<0.000000e+00> : vector<8x128xf32>
    %10 = tpu.matmul %8, %9, %cst_6 {dimension_numbers = #tpu.dot_dimension_numbers<[1], [0], [0], [1], [0, 0, 1, 1], [], []>} : vector<8x128xf32>, vector<128x128xf32>, vector<8x128xf32> -> vector<8x128xf32>
    %c0_7 = arith.constant 0 : index
    %c0_8 = arith.constant 0 : index
    %11 = vector.load %arg3[%c0_7, %c0_8] : memref<128x128xf32, #tpu.memory_space<vmem>>, vector<128x128xf32>
    %cst_9 = arith.constant dense<0.000000e+00> : vector<8x128xf32>
    %12 = tpu.matmul %1, %11, %cst_9 {dimension_numbers = #tpu.dot_dimension_numbers<[1], [0], [0], [1], [0, 0, 1, 1], [], []>} : vector<8x128xf32>, vector<128x128xf32>, vector<8x128xf32> -> vector<8x128xf32>
    %13 = arith.addf %10, %12 : vector<8x128xf32>
    %c0_10 = arith.constant 0 : index
    %c0_11 = arith.constant 0 : index
    %14 = vector.load %arg4[%c0_10, %c0_11] : memref<1x128xf32, #tpu.memory_space<vmem>>, vector<1x128xf32>
    %15 = vector.broadcast %14 : vector<1x128xf32> to vector<8x128xf32>
    %16 = arith.addf %13, %15 : vector<8x128xf32>
    %cst_12 = arith.constant 0.000000e+00 : f32
    %17 = vector.broadcast %cst_12 : f32 to vector<8x128xf32>
    %18 = arith.maximumf %16, %17 : vector<8x128xf32>
    %19 = tpu.iota {dimensions = array<i32: 0>} : vector<8x128xi32>
    %c8_i32 = arith.constant 8 : i32
    %20 = vector.broadcast %c8_i32 : i32 to vector<8x128xi32>
    %21 = arith.cmpi slt, %19, %20 : vector<8x128xi32>
    %22 = arith.extui %21 : vector<8x128xi1> to vector<8x128xi32>
    %23 = arith.sitofp %22 : vector<8x128xi32> to vector<8x128xf32>
    %24 = arith.mulf %18, %23 : vector<8x128xf32>
    %cst_13 = arith.constant dense<0.000000e+00> : vector<128xf32>
    %25 = vector.multi_reduction <add>, %24, %cst_13 [0] : vector<8x128xf32> to vector<128xf32>
    %26 = vector.shape_cast %25 : vector<128xf32> to vector<1x128xf32>
    %cst_14 = arith.constant 1.250000e-01 : f32
    %27 = vector.broadcast %cst_14 : f32 to vector<1x128xf32>
    %28 = arith.mulf %26, %27 : vector<1x128xf32>
    %29 = arith.mulf %24, %24 : vector<8x128xf32>
    %cst_15 = arith.constant dense<0.000000e+00> : vector<128xf32>
    %30 = vector.multi_reduction <add>, %29, %cst_15 [0] : vector<8x128xf32> to vector<128xf32>
    %31 = vector.shape_cast %30 : vector<128xf32> to vector<1x128xf32>
    %cst_16 = arith.constant 1.250000e-01 : f32
    %32 = vector.broadcast %cst_16 : f32 to vector<1x128xf32>
    %33 = arith.mulf %31, %32 : vector<1x128xf32>
    %34 = arith.mulf %28, %28 : vector<1x128xf32>
    %35 = arith.subf %33, %34 : vector<1x128xf32>
    %cst_17 = arith.constant 0.000000e+00 : f32
    %36 = vector.broadcast %cst_17 : f32 to vector<1x128xf32>
    %37 = arith.maximumf %35, %36 : vector<1x128xf32>
    %c0_18 = arith.constant 0 : index
    %c0_19 = arith.constant 0 : index
    %38 = vector.load %arg5[%c0_18, %c0_19] : memref<1x128xf32, #tpu.memory_space<vmem>>, vector<1x128xf32>
    %cst_20 = arith.constant 9.99999974E-6 : f32
    %39 = vector.broadcast %cst_20 : f32 to vector<1x128xf32>
    %40 = arith.addf %37, %39 : vector<1x128xf32>
    %41 = math.rsqrt %40 : vector<1x128xf32>
    %42 = arith.mulf %38, %41 : vector<1x128xf32>
    %43 = vector.broadcast %28 : vector<1x128xf32> to vector<8x128xf32>
    %44 = arith.subf %18, %43 : vector<8x128xf32>
    %45 = vector.broadcast %42 : vector<1x128xf32> to vector<8x128xf32>
    %46 = arith.mulf %44, %45 : vector<8x128xf32>
    %c0_21 = arith.constant 0 : index
    %c0_22 = arith.constant 0 : index
    %47 = vector.load %arg6[%c0_21, %c0_22] : memref<1x128xf32, #tpu.memory_space<vmem>>, vector<1x128xf32>
    %48 = vector.broadcast %47 : vector<1x128xf32> to vector<8x128xf32>
    %49 = arith.addf %46, %48 : vector<8x128xf32>
    %c0_23 = arith.constant 0 : index
    %c0_24 = arith.constant 0 : index
    %50 = vector.load %arg7[%c0_23, %c0_24] : memref<128x128xf32, #tpu.memory_space<vmem>>, vector<128x128xf32>
    %cst_25 = arith.constant dense<0.000000e+00> : vector<8x128xf32>
    %51 = tpu.matmul %49, %50, %cst_25 {dimension_numbers = #tpu.dot_dimension_numbers<[1], [0], [0], [1], [0, 0, 1, 1], [], []>} : vector<8x128xf32>, vector<128x128xf32>, vector<8x128xf32> -> vector<8x128xf32>
    %c0_26 = arith.constant 0 : index
    %c0_27 = arith.constant 0 : index
    %52 = vector.load %arg8[%c0_26, %c0_27] : memref<1x128xf32, #tpu.memory_space<vmem>>, vector<1x128xf32>
    %53 = vector.broadcast %52 : vector<1x128xf32> to vector<8x128xf32>
    %54 = arith.addf %51, %53 : vector<8x128xf32>
    %cst_28 = arith.constant 0.000000e+00 : f32
    %55 = vector.broadcast %cst_28 : f32 to vector<8x128xf32>
    %56 = arith.maximumf %54, %55 : vector<8x128xf32>
    %c0_29 = arith.constant 0 : index
    %c0_30 = arith.constant 0 : index
    %57 = vector.load %arg9[%c0_29, %c0_30] : memref<8x128xf32, #tpu.memory_space<vmem>>, vector<8x128xf32>
    tpu.vector_store %arg9[%c0_29, %c0_30], %56 {strides = array<i32>} : memref<8x128xf32, #tpu.memory_space<vmem>>, vector<8x128xf32>,
    return
  }
}

</mosaic_0001>

<bundles_post_ra>
// kernel: g_sage_forward.1
= control target key start
LH: loop header
LB: loop body
LE: loop exit
PB: predicated region body
PF: predicated region fallthrough
CT: control target
= control target key end

     0   :  { %vm41_vm0 = vcmask 1043456   ;;  %v701_v1 = vmov 0.0   ;;  %vm702_vm1 = vmmov 0   ;;  %s968_s0 = inlined_call_operand.vmem [shape: bf16[8,8], index: 0, kind: input, shape index: {}]   ;;  %s969_s1 = inlined_call_operand.vmem [shape: f32[8,128], index: 1, kind: input, shape index: {}]   ;;  %s970_s2 = inlined_call_operand.vmem [shape: f32[128,128], index: 2, kind: input, shape index: {}]   ;;  %s971_s3 = inlined_call_operand.vmem [shape: f32[128,128], index: 3, kind: input, shape index: {}]   ;;  %s972_s4 = inlined_call_operand.vmem [shape: f32[1,128], index: 4, kind: input, shape index: {}]   ;;  %s973_s5 = inlined_call_operand.vmem [shape: f32[1,128], index: 5, kind: input, shape index: {}]   ;;  %s974_s6 = inlined_call_operand.vmem [shape: f32[1,128], index: 6, kind: input, shape index: {}]   ;;  %s975_s7 = inlined_call_operand.vmem [shape: f32[128,128], index: 7, kind: input, shape index: {}]   ;;  %s976_s8 = inlined_call_operand.vmem [shape: f32[1,128], index: 8, kind: input, shape index: {}]   ;;  %s977_s9 = inlined_call_operand.hbm [shape: f32[8,128], index: 9, kind: output, shape index: {}]  }
   0x1   :  { %v759_v0 = vld [vmem:[%s969_s1] sm:$0xff]  ;;  %484 = vmatprep.subr.bf16.mxu0 %v701_v1  ;;  %486 = vmatprep.mubr.msk.bf16.mxu0 %vm702_vm1, %v701_v1 }
   0x2   :  { %v36_v2 = vpack.c.bf16 %v759_v0, %v759_v0 }
   0x3   :  { %14 = vsyncpa [#allocation3], 0  ;;  %522 = vmatprep.mubr.msk.f32.mxu1 %vm702_vm1, %v701_v1  ;;  %v34_v4 = vld [vmem:[%s968_s0] sm:$0xf]  ;;  %vm37_vm2 = vcmask 64512   ;;  %v703_v5 = vmov 4  }
   0x4   :  { %v43_v3 = vsel %vm41_vm0, %v36_v2, 0  ;;  %672 = vset.pattern.permute.xlu0 %v703_v5  ;;  %v109_v6 = vld [vmem:[%s971_s3] sm:$0xff]  ;;  %v110_v7 = vld [vmem:[%s971_s3 + $0x8] sm:$0xff]  ;;  %v704_v9 = vmov 0.0|0.0   ;;  %v111_v12 = vld [vmem:[%s971_s3 + $0x10] sm:$0xff]  ;;  %s705_s0 = smov [#allocation2]  }
   0x5   :  { %485 = vmatpush3.bf16.msra.mxu0 %v43_v3  ;;  %v93_v8 = vld [vmem:[%s970_s2] sm:$0xff]  ;;  %595 = vmatprep.subr.bf16.mxu1 %v704_v9  ;;  %v596_v10 = vpack.c.bf16 %v110_v7, %v109_v6  ;;  %v94_v11 = vld [vmem:[%s970_s2 + $0x8] sm:$0xff]  ;;  %v112_v13 = vld [vmem:[%s971_s3 + $0x18] sm:$0xff]  ;;  %s419_s18 = sshll.u32 %s705_s0, 4  ;;  %s420_s18 = int_to_ptr.vmem [resolvable:$true] %s419_s18 }
   0x6   :  { %619 = vmatprep.subr.bf16.mxu0 %v704_v9  ;;  %v620_v14 = vpack.c.bf16 %v94_v11, %v93_v8  ;;  %v95_v15 = vld [vmem:[%s970_s2 + $0x10] sm:$0xff]  ;;  %v96_v16 = vld [vmem:[%s970_s2 + $0x18] sm:$0xff]  ;;  %v599_v17 = vpack.c.bf16 %v112_v13, %v111_v12  ;;  %v113_v19 = vld [vmem:[%s971_s3 + $0x20] sm:$0xff]  ;;  %p682_p1 = scmp.lt.s32.totalorder %s420_s18, %s420_s18 }
   0x7   :  { %597 = vmatpush3.bf16.msra.mxu1 %v596_v10  ;;  %v623_v18 = vpack.c.bf16 %v96_v16, %v95_v15  ;;  %v114_v20 = vld [vmem:[%s971_s3 + $0x28] sm:$0xff]  ;;  %v97_v21 = vld [vmem:[%s970_s2 + $0x20] sm:$0xff]  ;;  %v115_v25 = vld [vmem:[%s971_s3 + $0x30] sm:$0xff] }
   0x8   :  { %487 = vmatmul.mubr.msk.bf16.vlgmr.msra.gmra.mrb[0].mxu0 %vm37_vm2, %v34_v4  ;;  %598 = vmatprep.subr.bf16.mxu1 %v704_v9  ;;  %v98_v22 = vld [vmem:[%s970_s2 + $0x28] sm:$0xff]  ;;  %v602_v23 = vpack.c.bf16 %v114_v20, %v113_v19  ;;  %v116_v26 = vld [vmem:[%s971_s3 + $0x38] sm:$0xff]  ;;  %v99_v27 = vld [vmem:[%s970_s2 + $0x30] sm:$0xff] }
   0x9   :  { %557 = vmatprep.mubr.msk.f32.mxu0 %vm702_vm1, %v701_v1  ;;  %621 = vmatpush3.bf16.msra.mxu0 %v620_v14  ;;  %v626_v24 = vpack.c.bf16 %v98_v22, %v97_v21  ;;  %v100_v28 = vld [vmem:[%s970_s2 + $0x38] sm:$0xff]  ;;  %v605_v29 = vpack.c.bf16 %v116_v26, %v115_v25  ;;  %v117_v31 = vld [vmem:[%s971_s3 + $0x40] sm:$0xff]  ;;  %v118_v32 = vld [vmem:[%s971_s3 + $0x48] sm:$0xff] }
   0xa   :  { %622 = vmatprep.subr.bf16.mxu0 %v704_v9  ;;  %v629_v30 = vpack.c.bf16 %v100_v28, %v99_v27  ;;  %v101_v33 = vld [vmem:[%s970_s2 + $0x40] sm:$0xff]  ;;  %v102_v34 = vld [vmem:[%s970_s2 + $0x48] sm:$0xff]  ;;  %v608_v35 = vpack.c.bf16 %v118_v32, %v117_v31  ;;  %v119_v40 = vld [vmem:[%s971_s3 + $0x50] sm:$0xff] }
   0xb   :  { %600 = vmatpush3.bf16.msra.mxu1 %v599_v17  ;;  %v632_v36 = vpack.c.bf16 %v102_v34, %v101_v33  ;;  %v120_v41 = vld [vmem:[%s971_s3 + $0x58] sm:$0xff]  ;;  %v103_v44 = vld [vmem:[%s970_s2 + $0x50] sm:$0xff]  ;;  %v121_v48 = vld [vmem:[%s971_s3 + $0x60] sm:$0xff] }
   0xc   :  { %601 = vmatprep.subr.bf16.mxu1 %v704_v9  ;;  %v611_v43 = vpack.c.bf16 %v120_v41, %v119_v40  ;;  %v104_v45 = vld [vmem:[%s970_s2 + $0x58] sm:$0xff]  ;;  %v122_v49 = vld [vmem:[%s971_s3 + $0x68] sm:$0xff]  ;;  %v105_v50 = vld [vmem:[%s970_s2 + $0x60] sm:$0xff] }
   0xd   :  { %624 = vmatpush3.bf16.msra.mxu0 %v623_v18  ;;  %v635_v47 = vpack.c.bf16 %v104_v45, %v103_v44  ;;  %v614_v51 = vpack.c.bf16 %v122_v49, %v121_v48  ;;  %v106_v52 = vld [vmem:[%s970_s2 + $0x68] sm:$0xff]  ;;  %v123_v54 = vld [vmem:[%s971_s3 + $0x70] sm:$0xff]  ;;  %v124_v55 = vld [vmem:[%s971_s3 + $0x78] sm:$0xff] }
   0xe   :  { %625 = vmatprep.subr.bf16.mxu0 %v704_v9  ;;  %v638_v53 = vpack.c.bf16 %v106_v52, %v105_v50  ;;  %v107_v56 = vld [vmem:[%s970_s2 + $0x70] sm:$0xff]  ;;  %v108_v57 = vld [vmem:[%s970_s2 + $0x78] sm:$0xff]  ;;  %v617_v58 = vpack.c.bf16 %v124_v55, %v123_v54  ;;  %v318_v3 = vld [vmem:[%s975_s7] sm:$0xff]  ;;  %v304_v50 = vlaneseq }
   0xf   :  { %603 = vmatpush3.bf16.msra.mxu1 %v602_v23  ;;  %v641_v59 = vpack.c.bf16 %v108_v57, %v107_v56  ;;  %v319_v4 = vld [vmem:[%s975_s7 + $0x8] sm:$0xff]  ;;  %v322_v7 = vld [vmem:[%s975_s7 + $0x20] sm:$0xff]  ;;  %v324_v11 = vld [vmem:[%s975_s7 + $0x30] sm:$0xff] }
  0x10   :  { %604 = vmatprep.subr.bf16.mxu1 %v704_v9  ;;  %v644_v5 = vpack.c.bf16 %v319_v4, %v318_v3  ;;  %v323_v8 = vld [vmem:[%s975_s7 + $0x28] sm:$0xff]  ;;  %v325_v12 = vld [vmem:[%s975_s7 + $0x38] sm:$0xff]  ;;  %v326_v14 = vld [vmem:[%s975_s7 + $0x40] sm:$0xff] }
  0x11   :  { %627 = vmatpush3.bf16.msra.mxu0 %v626_v24  ;;  %v650_v10 = vpack.c.bf16 %v323_v8, %v322_v7  ;;  %v653_v13 = vpack.c.bf16 %v325_v12, %v324_v11  ;;  %v327_v15 = vld [vmem:[%s975_s7 + $0x48] sm:$0xff]  ;;  %v328_v17 = vld [vmem:[%s975_s7 + $0x50] sm:$0xff]  ;;  %v329_v18 = vld [vmem:[%s975_s7 + $0x58] sm:$0xff] }
  0x12   :  { %628 = vmatprep.subr.bf16.mxu0 %v704_v9  ;;  %v656_v16 = vpack.c.bf16 %v327_v15, %v326_v14  ;;  %v659_v19 = vpack.c.bf16 %v329_v18, %v328_v17  ;;  %v330_v20 = vld [vmem:[%s975_s7 + $0x60] sm:$0xff]  ;;  %v331_v21 = vld [vmem:[%s975_s7 + $0x68] sm:$0xff]  ;;  %v332_v23 = vld [vmem:[%s975_s7 + $0x70] sm:$0xff] }
  0x13   :  { %606 = vmatpush3.bf16.msra.mxu1 %v605_v29  ;;  %v662_v22 = vpack.c.bf16 %v331_v21, %v330_v20  ;;  %v333_v24 = vld [vmem:[%s975_s7 + $0x78] sm:$0xff]  ;;  %v428_v27 = vld [vmem:[%s972_s4] ss:$0 sm:$0xff] }
  0x14   :  { %607 = vmatprep.subr.bf16.mxu1 %v704_v9  ;;  %v665_v25 = vpack.c.bf16 %v333_v24, %v332_v23  ;;  %v298_v52 = vld [vmem:[%s973_s5] sm:$0x1]  ;;  %s677_s5 = scalar_lea.vmem %s420_s18, 128 }
  0x15   :  { %630 = vmatpush3.bf16.msra.mxu0 %v629_v30  ;;  %p678_p0 = scmp.ne.s32.totalorder %s420_s18, %s677_s5  ;;  %p683_p2 = scmp.lt.s32.totalorder %s677_s5, %s677_s5 }
  0x16   :  { %631 = vmatprep.subr.bf16.mxu0 %v704_v9 }
  0x17   :  { %609 = vmatpush3.bf16.msra.mxu1 %v608_v35  ;;  %p684_p3 = por %p683_p2, %p682_p1 }
  0x18   :  { %610 = vmatprep.subr.bf16.mxu1 %v704_v9 }
  0x19   :  { %633 = vmatpush3.bf16.msra.mxu0 %v632_v36  ;;  %p685_p4 = pnand %p684_p3, %p678_p0 }
  0x1a   :  { %634 = vmatprep.subr.bf16.mxu0 %v704_v9 }
  0x1b   :  { %612 = vmatpush3.bf16.msra.mxu1 %v611_v43 }
  0x1c   :  { %613 = vmatprep.subr.bf16.mxu1 %v704_v9 }
  0x1d   :  { %636 = vmatpush3.bf16.msra.mxu0 %v635_v47 }
  0x1e   :  { %637 = vmatprep.subr.bf16.mxu0 %v704_v9 }
  0x1f   :  { %615 = vmatpush3.bf16.msra.mxu1 %v614_v51  ;;  %v305_v51 = vshrl.u32 %v304_v50, 7 }
  0x20   :  { %616 = vmatprep.subr.bf16.mxu1 %v704_v9 }
  0x21   :  { %639 = vmatpush3.bf16.msra.mxu0 %v638_v53  ;;  %v306_v53 = vsub.s32 0, %v305_v51 }
  0x22   :  { %640 = vmatprep.subr.bf16.mxu0 %v704_v9 }
  0x23   :  { %618 = vmatpush3.bf16.msra.mxu1 %v617_v58  ;;  %v429_v58 = vld [vmem:[%s974_s6] ss:$0 sm:$0xff] }
  0x24   :  { %643 = vmatprep.subr.bf16.mxu1 %v704_v9 }
  0x25   :  { %642 = vmatpush3.bf16.msra.mxu0 %v641_v59 }
  0x26   :  { %523 = vmatmul.mubr.f32.vlgmr.msra.gmra.mrb[0].mxu1 %v759_v0  ;;  %v320_v0 = vld [vmem:[%s975_s7 + $0x10] sm:$0xff] }
  0x27   :  { %592 = vmatprep.mubr.msk.f32.mxu1 %vm702_vm1, %v701_v1  ;;  %645 = vmatpush3.bf16.msra.mxu1 %v644_v5  ;;  %v321_v1 = vld [vmem:[%s975_s7 + $0x18] sm:$0xff] }
  0x28   :  { %646 = vmatprep.subr.bf16.mxu1 %v704_v9  ;;  %v647_v6 = vpack.c.bf16 %v321_v1, %v320_v0 }
  0x2b   :  { %648 = vmatpush3.bf16.msra.mxu1 %v647_v6 }
  0x2c   :  { %649 = vmatprep.subr.bf16.mxu1 %v704_v9 }
  0x2f   :  { %651 = vmatpush3.bf16.msra.mxu1 %v650_v10 }
  0x30   :  { %652 = vmatprep.subr.bf16.mxu1 %v704_v9 }
  0x33   :  { %654 = vmatpush3.bf16.msra.mxu1 %v653_v13 }
  0x34   :  { %655 = vmatprep.subr.bf16.mxu1 %v704_v9 }
  0x37   :  { %657 = vmatpush3.bf16.msra.mxu1 %v656_v16 }
  0x38   :  { %658 = vmatprep.subr.bf16.mxu1 %v704_v9 }
  0x3b   :  { %660 = vmatpush3.bf16.msra.mxu1 %v659_v19 }
  0x3c   :  { %661 = vmatprep.subr.bf16.mxu1 %v704_v9 }
  0x3f   :  { %663 = vmatpush3.bf16.msra.mxu1 %v662_v22 }
  0x40   :  { %664 = vmatprep.subr.bf16.mxu1 %v704_v9 }
  0x43   :  { %666 = vmatpush3.bf16.msra.mxu1 %v665_v25 }
  0xdb   :  { %v79_v37 = vpop.f32.mrb[0].mxu0 }
  0xdc   :  { %v488_v38 = vpop.f32.mrb[1].mxu0  ;;  %v85_v39 = vmax.f32 %v79_v37, 1.0 }
  0xdd   :  { %v82_v42 = vpop.f32.mrb[2].mxu0 }
  0xde   :  { %88 = vperm.xlu0 %672, %v85_v39   ;;  %v489_v46 = vpop.f32.mrb[3].mxu0 }
  0xf9   :  { %v191_v63 = vpop.f32.mrb[0].mxu1 }
  0xfa   :  { %v524_v2 = vpop.f32.mrb[1].mxu1 }
 0x15d   :  { %v89_v60 = vpop.permute.xlu0 %88 }
 0x15e   :  { %673 = vrcp.f32 %v89_v60 }
 0x168   :  { %v674_v61 = vpop.eup %673 }
 0x169   :  { %v92_v62 = vmul.f32 %v674_v61, %v79_v37  ;;  %v430_v61 = vld [vmem:[%s976_s8] ss:$0 sm:$0xff] }
 0x16b   :  { %558 = vmatmul.mubr.f32.vlgmr.msra.gmra.mrb[4].mxu0 %v92_v62 }
 0x23e   :  { %v261_v26 = vpop.f32.mrb[4].mxu0 }
 0x23f   :  { %v262_v28 = vadd.f32 %v261_v26, %v191_v63  ;;  %v559_v29 = vpop.f32.mrb[5].mxu0 }
 0x241   :  { %v272_v30 = vadd.f32 %v428_v27, %v262_v28 }
 0x243   :  { %v273_v31 = vmax.f32 %v272_v30, 0.0 }
 0x245   :  { %v280_v32 = vrot.slane %v273_v31, 4  ;;  %v287_v33 = vmul.f32 %v273_v31, %v273_v31 }
 0x247   :  { %v281_v34 = vadd.f32 %v280_v32, %v273_v31  ;;  %v288_v35 = vrot.slane %v287_v33, 4 }
 0x249   :  { %v282_v36 = vrot.slane %v281_v34, 2  ;;  %v289_v37 = vadd.f32 %v288_v35, %v287_v33 }
 0x24b   :  { %v283_v38 = vadd.f32 %v282_v36, %v281_v34  ;;  %v290_v39 = vrot.slane %v289_v37, 2 }
 0x24d   :  { %v284_v40 = vrot.slane %v283_v38, 1  ;;  %v291_v9 = vadd.f32 %v290_v39, %v289_v37 }
 0x24f   :  { %v285_v41 = vadd.f32 %v284_v40, %v283_v38  ;;  %v292_v42 = vrot.slane %v291_v9, 1 }
 0x251   :  { %v286_v43 = vmul.f32 0.125, %v285_v41  ;;  %v293_v44 = vadd.f32 %v292_v42, %v291_v9 }
 0x253   :  { %v294_v45 = vmul.f32 0.125, %v293_v44  ;;  %v295_v46 = vmul.f32 %v286_v43, %v286_v43  ;;  %v302_v56 = vsub.f32 %v273_v31, %v286_v43 }
 0x255   :  { %v296_v47 = vsub.f32 %v294_v45, %v295_v46 }
 0x257   :  { %v297_v48 = vmax.f32 %v296_v47, 0.0 }
 0x259   :  { %v299_v49 = vadd.f32 1e-05, %v297_v48 }
 0x25b   :  { %675 = vrsqrt.f32 %v299_v49 }
 0x265   :  { %v676_v54 = vpop.eup %675 }
 0x266   :  { %v301_v55 = vmul.f32 %v676_v54, %v298_v52 }
 0x268   :  { %v307_v57 = vrot.slane %v301_v55, %v306_v53 }
 0x26a   :  { %v309_v59 = vmul.f32 %v307_v57, %v302_v56 }
 0x26c   :  { %v317_v60 = vadd.f32 %v429_v58, %v309_v59 }
 0x26e   :  { %593 = vmatmul.mubr.f32.vlgmr.msra.gmra.mrb[2].mxu1 %v317_v60 }
 0x341   :  { %v407_v62 = vpop.f32.mrb[2].mxu1 }
 0x342   :  { %v408_v63 = vadd.f32 %v430_v61, %v407_v62  ;;  %v594_v2 = vpop.f32.mrb[3].mxu1 }
 0x344   :  { %v411_v3 = vmax.f32 %v408_v63, 0.0 }
 0x346   :  { %412 = vst [vmem:[#allocation2] sm:$0xff] %v411_v3 }
 0x347   :  { %688 = shalt.err (!%p685_p4)
}
 0x348   :  { %s689_s20 = scalar_lea.hbm %s977_s9, 128 }
 0x349   :  { %p690_p5 = scmp.ne.s32.totalorder %s977_s9, %s689_s20  ;;  %p693_p6 = scmp.lt.u32.totalorder %s689_s20, %s977_s9 }
 0x34b   :  { %p695_p7 = pnand %p693_p6, %p690_p5 }
 0x34d   :  { %698 = shalt.err (!%p695_p7)
}
 0x34e   :  { %422 = dma.vmem_to_hbm [thread:$0]  %s420_s18, 128, %s977_s9, [#allocation3]  }
 0x34f   :  { %699 = dma.done.wait [#allocation3], 128  }
 0x350   :  { %700 = vsyncadd [#allocation3], 4294967168 }
 0x351   :  { %426 = vsyncpa [#allocation3], 1 }

</bundles_post_ra>
